<compile_context>
chip_gen: v5e
topology: v5e:2x2
jax: 0.10.0
libtpu: 0.0.40
codegen_flags: <defaults>
</compile_context>

<pallas_src>
import jax
import jax.numpy as jnp
from jax.experimental import pallas as pl
from jax.experimental.pallas import tpu as pltpu

T_REF = 15.0
T_0 = -46.02
CLAMP_LO = 50.0
CLAMP_HI = 500.0

# ---- packed-buffer layout (config: dim_t=16, hidden=32, dim_z_phy=dim_z_aux=1) ----
LANES = 128
IN_W = 32                       # input slab lanes: [x(16) | T_air | eps_phy | eps_aux | pad]
OUT_W = 8                       # output slab lanes: [zpm | zpl | zam | zal | nee | pad*3]
COL_TAIR, COL_EPS_PHY, COL_EPS_AUX = 16, 17, 18

W1_R0, W1_NR = 0, IN_W          # feature L1 (rows 0..15 real, rest zero)
W2_R0, W2_NR = 32, 128          # feature L2
U1_R0, U1_NR = 160, 128         # unmixer hidden
U2_R0, U2_NR = 288, 128         # unmixer out (-> dim_t)
H1_R0, H1_NR = 416, 128         # fused head layer-1 (16 x 128 real)
H2_R0, H2_NR = 544, 128         # fused block-diagonal head layer-2 (128 x 4 real)
W_ROWS = 672                    # total packed weight rows
B_ROWS = 8                      # packed bias rows (6 used)


def climate_vae_kernel(in_ref, w_ref, b_ref, out_ref):
    """One batch tile: full encoder + reparameterize + physics decoder."""
    f32 = jnp.float32
    cd = w_ref.dtype                       # MXU operand dtype (bf16 or f32)
    xin = in_ref[...]                      # (TB, 32) f32

    def lin(h, r0, nrows, brow):
        w = w_ref[r0:r0 + nrows, :]                    # static, sublane-aligned slice
        b = b_ref[brow:brow + 1, :]                    # (1, 128) f32
        return jnp.dot(h.astype(cd), w, preferred_element_type=f32) + b

    relu = lambda v: jnp.maximum(v, 0.0)

    # ---- FeatureExtractor ----
    h = relu(lin(xin, W1_R0, W1_NR, 0))                # (TB, 128), lanes 0..31 live
    h = relu(lin(h, W2_R0, W2_NR, 1))
    # ---- unmixer MLP ----
    u = relu(lin(h, U1_R0, U1_NR, 2))
    unmixed = lin(u, U2_R0, U2_NR, 3)                  # lanes 0..15 live (dim_t)
    # ---- four latent heads, fused into two lane-dense matmuls ----
    hh = relu(lin(unmixed, H1_R0, H1_NR, 4))           # (TB, 128) = 4 heads x 32 hidden
    heads = lin(hh, H2_R0, H2_NR, 5)                   # lanes: 0=zpm 1=zpl 2=zam 3=zal

    zpm = heads[:, 0:1]
    zpl = heads[:, 1:2]
    zam = heads[:, 2:3]
    zal = heads[:, 3:4]

    t_air = xin[:, COL_TAIR:COL_TAIR + 1]
    e_phy = xin[:, COL_EPS_PHY:COL_EPS_PHY + 1]
    e_aux = xin[:, COL_EPS_AUX:COL_EPS_AUX + 1]

    # ---- reparameterize + clamp/abs (f32 VPU/EUP) ----
    z_phy = jnp.clip(zpm + e_phy * jnp.exp(0.5 * zpl), CLAMP_LO, CLAMP_HI)
    z_aux = jnp.abs(zam + e_aux * jnp.exp(0.5 * zal))

    # ---- physics decoder ----
    term = 1.0 / (T_REF - T_0) - 1.0 / (t_air - T_0)
    nee = jnp.exp(z_phy * term) * z_aux

    # ---- single lane-packed output slab ----
    out_ref[:, 0:4] = heads[:, 0:4]
    out_ref[:, 4:5] = nee
    out_ref[:, 5:8] = jnp.zeros_like(heads[:, 5:8])


def _round_up(n, m):
    return (n + m - 1) // m * m


def pack_params(params, compute_dtype=jnp.bfloat16):
    """Pack the 24 weight/bias arrays into two flat 128-lane buffers."""
    (fw1, fb1, fw2, fb2,
     uw1, ub1, uw2, ub2,
     pmw1, pmb1, pmw2, pmb2,
     plw1, plb1, plw2, plb2,
     amw1, amb1, amw2, amb2,
     alw1, alb1, alw2, alb2) = params

    assert fw1.shape[0] + 3 <= IN_W, "x + (T_air, eps_phy, eps_aux) must fit the input slab"
    H = pmw1.shape[1]
    assert 4 * H == LANES, "fused head layer-1 must fill exactly 128 lanes"

    def pad(a, rows, cols=LANES):
        return jnp.pad(a, ((0, rows - a.shape[0]), (0, cols - a.shape[1])))

    # fused head layer-1: [pmw1 | plw1 | amw1 | alw1]  -> (dim_t, 128)
    h1w = jnp.concatenate([pmw1, plw1, amw1, alw1], axis=1)
    h1b = jnp.concatenate([pmb1, plb1, amb1, alb1], axis=1)
    # fused head layer-2: block-diagonal (128, 4); col j reads hidden block j
    h2w = jnp.zeros((4 * H, 4), jnp.float32)
    h2w = h2w.at[0 * H:1 * H, 0:1].set(pmw2)
    h2w = h2w.at[1 * H:2 * H, 1:2].set(plw2)
    h2w = h2w.at[2 * H:3 * H, 2:3].set(amw2)
    h2w = h2w.at[3 * H:4 * H, 3:4].set(alw2)
    h2b = jnp.concatenate([pmb2, plb2, amb2, alb2], axis=1)

    w_buf = jnp.concatenate([
        pad(fw1, W1_NR), pad(fw2, W2_NR), pad(uw1, U1_NR),
        pad(uw2, U2_NR), pad(h1w, H1_NR), pad(h2w, H2_NR)], axis=0)
    b_buf = jnp.concatenate([
        pad(fb1, 1), pad(fb2, 1), pad(ub1, 1), pad(ub2, 1),
        pad(h1b, 1), pad(h2b, 1), jnp.zeros((2, LANES), jnp.float32)], axis=0)

    assert w_buf.shape == (W_ROWS, LANES) and b_buf.shape == (B_ROWS, LANES)
    return w_buf.astype(compute_dtype), b_buf.astype(jnp.float32)


def climate_vae_forward(x, T_air, eps_phy, eps_aux, params, x_lnvar,
                        *, tile_b=1024, compute_dtype=jnp.bfloat16, packed=None):
    B = x.shape[0]
    if packed is None:
        packed = pack_params(params, compute_dtype)
    w_buf, b_buf = packed

    tb = min(tile_b, _round_up(B, 8))
    Bp = _round_up(B, tb)

    # pack x / T_air / eps into a single f32 input slab (pad rows are zero)
    slab = jnp.zeros((Bp, IN_W), jnp.float32)
    slab = slab.at[:B, 0:x.shape[1]].set(x.astype(jnp.float32))
    slab = slab.at[:B, COL_TAIR:COL_TAIR + 1].set(T_air.astype(jnp.float32))
    slab = slab.at[:B, COL_EPS_PHY:COL_EPS_PHY + 1].set(eps_phy.astype(jnp.float32))
    slab = slab.at[:B, COL_EPS_AUX:COL_EPS_AUX + 1].set(eps_aux.astype(jnp.float32))

    out = pl.pallas_call(
        climate_vae_kernel,
        out_shape=jax.ShapeDtypeStruct((Bp, OUT_W), jnp.float32),
        grid=(Bp // tb,),
        in_specs=[
            pl.BlockSpec((tb, IN_W), lambda i: (i, 0)),          # batch-tiled input slab
            pl.BlockSpec((W_ROWS, LANES), lambda i: (0, 0)),     # VMEM-resident weights
            pl.BlockSpec((B_ROWS, LANES), lambda i: (0, 0)),     # VMEM-resident biases
        ],
        out_specs=pl.BlockSpec((tb, OUT_W), lambda i: (i, 0)),
        compiler_params=pltpu.CompilerParams(
            dimension_semantics=("parallel",)),                  # shard grid across TCs (v7x)
    )(slab, w_buf, b_buf)

    z_phy_stat = {"mean": out[:B, 0:1], "lnvar": out[:B, 1:2]}
    z_aux_stat = {"mean": out[:B, 2:3], "lnvar": out[:B, 3:4]}
    nee = out[:B, 4:5]
    return z_phy_stat, z_aux_stat, nee, x_lnvar


# ------------------- pure-JAX reference (for correctness check) -------------------
def ref_forward(x, T_air, eps_phy, eps_aux, p):
    (fw1, fb1, fw2, fb2,
     uw1, ub1, uw2, ub2,
     pmw1, pmb1, pmw2, pmb2,
     plw1, plb1, plw2, plb2,
     amw1, amb1, amw2, amb2,
     alw1, alb1, alw2, alb2) = p
    relu = lambda h: jnp.maximum(h, 0.0)
    lin = lambda h, w, b: h @ w + b
    h = relu(lin(x, fw1, fb1))
    h = relu(lin(h, fw2, fb2))
    u = relu(lin(h, uw1, ub1))
    unmixed = lin(u, uw2, ub2)
    zpm = lin(relu(lin(unmixed, pmw1, pmb1)), pmw2, pmb2)
    zpl = lin(relu(lin(unmixed, plw1, plb1)), plw2, plb2)
    zam = lin(relu(lin(unmixed, amw1, amb1)), amw2, amb2)
    zal = lin(relu(lin(unmixed, alw1, alb1)), alw2, alb2)
    z_phy = jnp.clip(zpm + eps_phy * jnp.exp(0.5 * zpl), CLAMP_LO, CLAMP_HI)
    z_aux = jnp.abs(zam + eps_aux * jnp.exp(0.5 * zal))
    term = 1.0 / (T_REF - T_0) - 1.0 / (T_air - T_0)
    nee = jnp.exp(z_phy * term) * z_aux
    return zpm, zpl, zam, zal, nee


def init_linear(key, din, dout, scale=0.1):
    kw, kb = jax.random.split(key)
    w = jax.random.normal(kw, (din, dout), jnp.float32) * scale
    b = jax.random.normal(kb, (1, dout), jnp.float32) * scale
    return w, b


if __name__ == "__main__":
    # config: dim_t=16, dim_z_phy=1, dim_z_aux=1, activation='relu',
    # hidlayers_feat=[32,32], hidlayers_unmixer=[32,32],
    # hidlayers_phy=[32], hidlayers_aux_enc=[32], x_lnvar=-2.0
    B, DIM_T, H = 8, 16, 32

    root = jax.random.PRNGKey(0)
    keys = jax.random.split(root, 20)

    fw1, fb1 = init_linear(keys[0], DIM_T, H)      # FeatureExtractor L1
    fw2, fb2 = init_linear(keys[1], H, H)          # FeatureExtractor L2
    uw1, ub1 = init_linear(keys[2], H, H)          # unmixer hidden
    uw2, ub2 = init_linear(keys[3], H, DIM_T)      # unmixer out -> dim_t
    pmw1, pmb1 = init_linear(keys[4], DIM_T, H)    # z_phy mean
    pmw2, pmb2 = init_linear(keys[5], H, 1)
    plw1, plb1 = init_linear(keys[6], DIM_T, H)    # z_phy lnvar
    plw2, plb2 = init_linear(keys[7], H, 1)
    amw1, amb1 = init_linear(keys[8], DIM_T, H)    # z_aux mean
    amw2, amb2 = init_linear(keys[9], H, 1)
    alw1, alb1 = init_linear(keys[10], DIM_T, H)   # z_aux lnvar
    alw2, alb2 = init_linear(keys[11], H, 1)

    params = [fw1, fb1, fw2, fb2,
              uw1, ub1, uw2, ub2,
              pmw1, pmb1, pmw2, pmb2,
              plw1, plb1, plw2, plb2,
              amw1, amb1, amw2, amb2,
              alw1, alb1, alw2, alb2]

    x = jax.random.normal(keys[12], (B, DIM_T), jnp.float32)
    T_air = jax.random.uniform(keys[13], (B, 1), jnp.float32, 0.0, 30.0)
    eps_phy = jax.random.normal(keys[14], (B, 1), jnp.float32)
    eps_aux = jax.random.normal(keys[15], (B, 1), jnp.float32)
    x_lnvar = jnp.ones((1,), jnp.float32) * (-2.0)   # register_buffer param_x_lnvar

    r_zpm, r_zpl, r_zam, r_zal, r_nee = ref_forward(x, T_air, eps_phy, eps_aux, params)

    # ---- 1) f32 MXU path: tight semantic check against the reference ----
    zps, zas, nee, lnvar = climate_vae_forward(
        x, T_air, eps_phy, eps_aux, params, x_lnvar, compute_dtype=jnp.float32)
    jax.block_until_ready(nee)
    assert jnp.allclose(zps["mean"], r_zpm, atol=1e-5)
    assert jnp.allclose(zps["lnvar"], r_zpl, atol=1e-5)
    assert jnp.allclose(zas["mean"], r_zam, atol=1e-5)
    assert jnp.allclose(zas["lnvar"], r_zal, atol=1e-5)
    assert jnp.allclose(nee, r_nee, atol=1e-4, rtol=1e-4)
    assert lnvar.shape == (1,)

    # ---- 2) bf16 MXU operands (default perf path; f32 accumulation + epilogue) ----
    zps_b, zas_b, nee_b, _ = climate_vae_forward(
        x, T_air, eps_phy, eps_aux, params, x_lnvar)
    jax.block_until_ready(nee_b)
    assert jnp.allclose(zps_b["mean"], r_zpm, atol=3e-2, rtol=3e-2)
    assert jnp.allclose(zps_b["lnvar"], r_zpl, atol=3e-2, rtol=3e-2)
    assert jnp.allclose(zas_b["mean"], r_zam, atol=3e-2, rtol=3e-2)
    assert jnp.allclose(zas_b["lnvar"], r_zal, atol=3e-2, rtol=3e-2)
    assert jnp.allclose(nee_b, r_nee, atol=3e-2, rtol=3e-2)

    # ---- 3) multi-step batch grid with padding (B=20, tile=8 -> 3 grid steps) ----
    B2 = 20
    x2 = jax.random.normal(keys[16], (B2, DIM_T), jnp.float32)
    T2 = jax.random.uniform(keys[17], (B2, 1), jnp.float32, 0.0, 30.0)
    e2p = jax.random.normal(keys[18], (B2, 1), jnp.float32)
    e2a = jax.random.normal(keys[19], (B2, 1), jnp.float32)
    g_zpm, g_zpl, g_zam, g_zal, g_nee = ref_forward(x2, T2, e2p, e2a, params)
    zps2, zas2, nee2, _ = climate_vae_forward(
        x2, T2, e2p, e2a, params, x_lnvar, tile_b=8, compute_dtype=jnp.float32)
    jax.block_until_ready(nee2)
    assert jnp.allclose(zps2["mean"], g_zpm, atol=1e-5)
    assert jnp.allclose(zps2["lnvar"], g_zpl, atol=1e-5)
    assert jnp.allclose(zas2["mean"], g_zam, atol=1e-5)
    assert jnp.allclose(zas2["lnvar"], g_zal, atol=1e-5)
    assert jnp.allclose(nee2, g_nee, atol=1e-4, rtol=1e-4)

    print("KERNEL_OK")
</pallas_src>

<mosaic_0001>
module attributes {stable_mosaic.version = 11 : i64} {
  func.func @climate_vae_kernel(%arg0: i32, %arg1: memref<8x32xf32, #tpu.memory_space<vmem>>, %arg2: memref<672x128xf32, #tpu.memory_space<vmem>>, %arg3: memref<8x128xf32, #tpu.memory_space<vmem>>, %arg4: memref<8x8xf32, #tpu.memory_space<vmem>>) attributes {dimension_semantics = [#tpu.dimension_semantics<parallel>], iteration_bounds = array<i64: 1>, scalar_prefetch = 0 : i64, scratch_operands = 0 : i64, tpu.core_type = #tpu.core_type<tc>, window_params = [{transform_indices = @transform_0, window_bounds = array<i64: 8, 32>}, {pipeline_mode = #tpu.pipeline_mode<synchronous>, transform_indices = @transform_1, window_bounds = array<i64: 672, 128>}, {pipeline_mode = #tpu.pipeline_mode<synchronous>, transform_indices = @transform_2, window_bounds = array<i64: 8, 128>}, {transform_indices = @transform_3, window_bounds = array<i64: 8, 8>}]} {
    %c0 = arith.constant 0 : index
    %c0_0 = arith.constant 0 : index
    %0 = vector.load %arg1[%c0, %c0_0] : memref<8x32xf32, #tpu.memory_space<vmem>>, vector<8x32xf32>
    %c0_1 = arith.constant 0 : index
    %c0_2 = arith.constant 0 : index
    %1 = vector.load %arg2[%c0_1, %c0_2] : memref<672x128xf32, #tpu.memory_space<vmem>>, vector<32x128xf32>
    %c0_3 = arith.constant 0 : index
    %c0_4 = arith.constant 0 : index
    %2 = vector.load %arg3[%c0_3, %c0_4] : memref<8x128xf32, #tpu.memory_space<vmem>>, vector<1x128xf32>
    %cst = arith.constant dense<0.000000e+00> : vector<8x128xf32>
    %3 = tpu.matmul %0, %1, %cst {dimension_numbers = #tpu.dot_dimension_numbers<[1], [0], [0], [1], [0, 0, 1, 1], [], []>} : vector<8x32xf32>, vector<32x128xf32>, vector<8x128xf32> -> vector<8x128xf32>
    %4 = vector.broadcast %2 : vector<1x128xf32> to vector<8x128xf32>
    %5 = arith.addf %3, %4 : vector<8x128xf32>
    %cst_5 = arith.constant 0.000000e+00 : f32
    %6 = vector.broadcast %cst_5 : f32 to vector<8x128xf32>
    %7 = arith.maximumf %5, %6 : vector<8x128xf32>
    %c32 = arith.constant 32 : index
    %c0_6 = arith.constant 0 : index
    %8 = vector.load %arg2[%c32, %c0_6] : memref<672x128xf32, #tpu.memory_space<vmem>>, vector<128x128xf32>
    %c1 = arith.constant 1 : index
    %c0_7 = arith.constant 0 : index
    %9 = vector.load %arg3[%c1, %c0_7] : memref<8x128xf32, #tpu.memory_space<vmem>>, vector<1x128xf32>
    %cst_8 = arith.constant dense<0.000000e+00> : vector<8x128xf32>
    %10 = tpu.matmul %7, %8, %cst_8 {dimension_numbers = #tpu.dot_dimension_numbers<[1], [0], [0], [1], [0, 0, 1, 1], [], []>} : vector<8x128xf32>, vector<128x128xf32>, vector<8x128xf32> -> vector<8x128xf32>
    %11 = vector.broadcast %9 : vector<1x128xf32> to vector<8x128xf32>
    %12 = arith.addf %10, %11 : vector<8x128xf32>
    %cst_9 = arith.constant 0.000000e+00 : f32
    %13 = vector.broadcast %cst_9 : f32 to vector<8x128xf32>
    %14 = arith.maximumf %12, %13 : vector<8x128xf32>
    %c160 = arith.constant 160 : index
    %c0_10 = arith.constant 0 : index
    %15 = vector.load %arg2[%c160, %c0_10] : memref<672x128xf32, #tpu.memory_space<vmem>>, vector<128x128xf32>
    %c2 = arith.constant 2 : index
    %c0_11 = arith.constant 0 : index
    %16 = vector.load %arg3[%c2, %c0_11] : memref<8x128xf32, #tpu.memory_space<vmem>>, vector<1x128xf32>
    %cst_12 = arith.constant dense<0.000000e+00> : vector<8x128xf32>
    %17 = tpu.matmul %14, %15, %cst_12 {dimension_numbers = #tpu.dot_dimension_numbers<[1], [0], [0], [1], [0, 0, 1, 1], [], []>} : vector<8x128xf32>, vector<128x128xf32>, vector<8x128xf32> -> vector<8x128xf32>
    %18 = vector.broadcast %16 : vector<1x128xf32> to vector<8x128xf32>
    %19 = arith.addf %17, %18 : vector<8x128xf32>
    %cst_13 = arith.constant 0.000000e+00 : f32
    %20 = vector.broadcast %cst_13 : f32 to vector<8x128xf32>
    %21 = arith.maximumf %19, %20 : vector<8x128xf32>
    %c288 = arith.constant 288 : index
    %c0_14 = arith.constant 0 : index
    %22 = vector.load %arg2[%c288, %c0_14] : memref<672x128xf32, #tpu.memory_space<vmem>>, vector<128x128xf32>
    %c3 = arith.constant 3 : index
    %c0_15 = arith.constant 0 : index
    %23 = vector.load %arg3[%c3, %c0_15] : memref<8x128xf32, #tpu.memory_space<vmem>>, vector<1x128xf32>
    %cst_16 = arith.constant dense<0.000000e+00> : vector<8x128xf32>
    %24 = tpu.matmul %21, %22, %cst_16 {dimension_numbers = #tpu.dot_dimension_numbers<[1], [0], [0], [1], [0, 0, 1, 1], [], []>} : vector<8x128xf32>, vector<128x128xf32>, vector<8x128xf32> -> vector<8x128xf32>
    %25 = vector.broadcast %23 : vector<1x128xf32> to vector<8x128xf32>
    %26 = arith.addf %24, %25 : vector<8x128xf32>
    %c416 = arith.constant 416 : index
    %c0_17 = arith.constant 0 : index
    %27 = vector.load %arg2[%c416, %c0_17] : memref<672x128xf32, #tpu.memory_space<vmem>>, vector<128x128xf32>
    %c4 = arith.constant 4 : index
    %c0_18 = arith.constant 0 : index
    %28 = vector.load %arg3[%c4, %c0_18] : memref<8x128xf32, #tpu.memory_space<vmem>>, vector<1x128xf32>
    %cst_19 = arith.constant dense<0.000000e+00> : vector<8x128xf32>
    %29 = tpu.matmul %26, %27, %cst_19 {dimension_numbers = #tpu.dot_dimension_numbers<[1], [0], [0], [1], [0, 0, 1, 1], [], []>} : vector<8x128xf32>, vector<128x128xf32>, vector<8x128xf32> -> vector<8x128xf32>
    %30 = vector.broadcast %28 : vector<1x128xf32> to vector<8x128xf32>
    %31 = arith.addf %29, %30 : vector<8x128xf32>
    %cst_20 = arith.constant 0.000000e+00 : f32
    %32 = vector.broadcast %cst_20 : f32 to vector<8x128xf32>
    %33 = arith.maximumf %31, %32 : vector<8x128xf32>
    %c544 = arith.constant 544 : index
    %c0_21 = arith.constant 0 : index
    %34 = vector.load %arg2[%c544, %c0_21] : memref<672x128xf32, #tpu.memory_space<vmem>>, vector<128x128xf32>
    %c5 = arith.constant 5 : index
    %c0_22 = arith.constant 0 : index
    %35 = vector.load %arg3[%c5, %c0_22] : memref<8x128xf32, #tpu.memory_space<vmem>>, vector<1x128xf32>
    %cst_23 = arith.constant dense<0.000000e+00> : vector<8x128xf32>
    %36 = tpu.matmul %33, %34, %cst_23 {dimension_numbers = #tpu.dot_dimension_numbers<[1], [0], [0], [1], [0, 0, 1, 1], [], []>} : vector<8x128xf32>, vector<128x128xf32>, vector<8x128xf32> -> vector<8x128xf32>
    %37 = vector.broadcast %35 : vector<1x128xf32> to vector<8x128xf32>
    %38 = arith.addf %36, %37 : vector<8x128xf32>
    %39 = vector.extract_strided_slice %38 {offsets = [0, 0], sizes = [8, 1], strides = [1, 1]} : vector<8x128xf32> to vector<8x1xf32>
    %40 = vector.extract_strided_slice %38 {offsets = [0, 1], sizes = [8, 1], strides = [1, 1]} : vector<8x128xf32> to vector<8x1xf32>
    %41 = vector.extract_strided_slice %38 {offsets = [0, 2], sizes = [8, 1], strides = [1, 1]} : vector<8x128xf32> to vector<8x1xf32>
    %42 = vector.extract_strided_slice %38 {offsets = [0, 3], sizes = [8, 1], strides = [1, 1]} : vector<8x128xf32> to vector<8x1xf32>
    %43 = vector.extract_strided_slice %0 {offsets = [0, 16], sizes = [8, 1], strides = [1, 1]} : vector<8x32xf32> to vector<8x1xf32>
    %44 = vector.extract_strided_slice %0 {offsets = [0, 17], sizes = [8, 1], strides = [1, 1]} : vector<8x32xf32> to vector<8x1xf32>
    %45 = vector.extract_strided_slice %0 {offsets = [0, 18], sizes = [8, 1], strides = [1, 1]} : vector<8x32xf32> to vector<8x1xf32>
    %cst_24 = arith.constant 5.000000e-01 : f32
    %46 = vector.broadcast %cst_24 : f32 to vector<8x1xf32>
    %47 = arith.mulf %46, %40 : vector<8x1xf32>
    %48 = math.exp %47 : vector<8x1xf32>
    %49 = arith.mulf %44, %48 : vector<8x1xf32>
    %50 = arith.addf %39, %49 : vector<8x1xf32>
    %cst_25 = arith.constant 5.000000e+01 : f32
    %cst_26 = arith.constant 5.000000e+02 : f32
    %51 = vector.broadcast %cst_25 : f32 to vector<8x1xf32>
    %52 = arith.maximumf %51, %50 : vector<8x1xf32>
    %53 = vector.broadcast %cst_26 : f32 to vector<8x1xf32>
    %54 = arith.minimumf %53, %52 : vector<8x1xf32>
    %cst_27 = arith.constant 5.000000e-01 : f32
    %55 = vector.broadcast %cst_27 : f32 to vector<8x1xf32>
    %56 = arith.mulf %55, %42 : vector<8x1xf32>
    %57 = math.exp %56 : vector<8x1xf32>
    %58 = arith.mulf %45, %57 : vector<8x1xf32>
    %59 = arith.addf %41, %58 : vector<8x1xf32>
    %60 = math.absf %59 : vector<8x1xf32>
    %cst_28 = arith.constant -4.602000e+01 : f32
    %61 = vector.broadcast %cst_28 : f32 to vector<8x1xf32>
    %62 = arith.subf %43, %61 : vector<8x1xf32>
    %cst_29 = arith.constant 1.000000e+00 : f32
    %63 = vector.broadcast %cst_29 : f32 to vector<8x1xf32>
    %64 = arith.divf %63, %62 : vector<8x1xf32>
    %cst_30 = arith.constant 0.0163880698 : f32
    %65 = vector.broadcast %cst_30 : f32 to vector<8x1xf32>
    %66 = arith.subf %65, %64 : vector<8x1xf32>
    %67 = arith.mulf %54, %66 : vector<8x1xf32>
    %68 = math.exp %67 : vector<8x1xf32>
    %69 = arith.mulf %68, %60 : vector<8x1xf32>
    %70 = vector.extract_strided_slice %38 {offsets = [0, 0], sizes = [8, 4], strides = [1, 1]} : vector<8x128xf32> to vector<8x4xf32>
    %c0_31 = arith.constant 0 : index
    %c0_32 = arith.constant 0 : index
    %71 = vector.load %arg4[%c0_31, %c0_32] : memref<8x8xf32, #tpu.memory_space<vmem>>, vector<8x4xf32>
    tpu.vector_store %arg4[%c0_31, %c0_32], %70 {strides = array<i32>} : memref<8x8xf32, #tpu.memory_space<vmem>>, vector<8x4xf32>,
    %c0_33 = arith.constant 0 : index
    %c4_34 = arith.constant 4 : index
    %72 = vector.load %arg4[%c0_33, %c4_34] : memref<8x8xf32, #tpu.memory_space<vmem>>, vector<8x1xf32>
    tpu.vector_store %arg4[%c0_33, %c4_34], %69 {strides = array<i32>} : memref<8x8xf32, #tpu.memory_space<vmem>>, vector<8x1xf32>,
    %cst_35 = arith.constant 0.000000e+00 : f32
    %73 = vector.broadcast %cst_35 : f32 to vector<8x3xf32>
    %c0_36 = arith.constant 0 : index
    %c5_37 = arith.constant 5 : index
    %74 = vector.load %arg4[%c0_36, %c5_37] : memref<8x8xf32, #tpu.memory_space<vmem>>, vector<8x3xf32>
    tpu.vector_store %arg4[%c0_36, %c5_37], %73 {strides = array<i32>} : memref<8x8xf32, #tpu.memory_space<vmem>>, vector<8x3xf32>,
    return
  }
  func.func @transform_0(%arg0: i32) -> (i32, i32) {
    %c0_i32 = arith.constant 0 : i32
    %c0_i32_0 = arith.constant 0 : i32
    return %arg0, %c0_i32 : i32, i32
  }
  func.func @transform_1(%arg0: i32) -> (i32, i32) {
    %c0_i32 = arith.constant 0 : i32
    %c0_i32_0 = arith.constant 0 : i32
    %c0_i32_1 = arith.constant 0 : i32
    return %c0_i32, %c0_i32_0 : i32, i32
  }
  func.func @transform_2(%arg0: i32) -> (i32, i32) {
    %c0_i32 = arith.constant 0 : i32
    %c0_i32_0 = arith.constant 0 : i32
    %c0_i32_1 = arith.constant 0 : i32
    return %c0_i32, %c0_i32_0 : i32, i32
  }
  func.func @transform_3(%arg0: i32) -> (i32, i32) {
    %c0_i32 = arith.constant 0 : i32
    %c0_i32_0 = arith.constant 0 : i32
    return %arg0, %c0_i32 : i32, i32
  }
}

</mosaic_0001>

<bundles_post_ra>
// kernel: tpu_custom_call.1
= control target key start
LH: loop header
LB: loop body
LE: loop exit
PB: predicated region body
PF: predicated region fallthrough
CT: control target
= control target key end

     0   :  { %8 = vsyncpa [#allocation3], 0  ;;  %s545_s0 = inlined_call_operand.hbm [shape: f32[8,32], index: 0, kind: input, shape index: {}]   ;;  %s546_s1 = inlined_call_operand.hbm [shape: f32[672,128], index: 1, kind: input, shape index: {}]   ;;  %s547_s2 = inlined_call_operand.hbm [shape: f32[8,128], index: 2, kind: input, shape index: {}]   ;;  %s548_s3 = inlined_call_operand.hbm [shape: f32[8,8], index: 3, kind: output, shape index: {}]  }
   0x1   :  { %9 = vsyncpa [#allocation6], 0  ;;  %s26_s14 = sshll.u32 %s546_s1, 4  ;;  %s27_s14 = int_to_ptr.hbm [resolvable:$true] %s26_s14 }
   0x2   :  { %10 = vsyncpa [#allocation4], 0  ;;  %s494_s15 = smov [#allocation5]   ;;  %s16_s19 = sshll.u32 %s545_s0, 4  ;;  %s17_s19 = int_to_ptr.hbm [resolvable:$true] %s16_s19 }
   0x3   :  { %s28_s16 = sshll.u32 %s494_s15, 4  ;;  %s495_s20 = smov 128   ;;  %s29_s16 = int_to_ptr.vmem [resolvable:$true] %s28_s16 }
   0x4   :  { %s496_s21 = smov 8   ;;  %s497_s22 = smov [#allocation2]  }
   0x5   :  { %34 = dma.hbm_to_vmem [thread:$0]  %s27_s14, 10752, %s29_s16, [#allocation6], %s495_s20, %s495_s20, %s496_s21  }
   0x6   :  { %s18_s23 = sshll.u32 %s497_s22, 4  ;;  %s40_s26 = sshll.u32 %s547_s2, 4  ;;  %s19_s23 = int_to_ptr.vmem [resolvable:$true] %s18_s23  ;;  %s41_s26 = int_to_ptr.hbm [resolvable:$true] %s40_s26 }
   0x7   :  { %21 = dma.hbm_to_vmem [thread:$0]  %s17_s19, 128, %s19_s23, [#allocation3]  }
   0x8   :  { %s498_s1 = smov [#allocation7]  }
   0x9   :  { %s42_s27 = sshll.u32 %s498_s1, 4  ;;  %s43_s27 = int_to_ptr.vmem [resolvable:$true] %s42_s27 }
   0xa   :  { %45 = dma.hbm_to_vmem [thread:$0]  %s41_s26, 128, %s43_s27, [#allocation6]  }
   0xb   :  { %488 = dma.done.wait [#allocation3], 128  }
   0xc   :  { %489 = vsyncadd [#allocation3], 4294967168 }
   0xd   :  { %490 = dma.done.wait [#allocation6], 10880  }
   0xe   :  { %491 = vsyncadd [#allocation6], 4294956416  ;;  %v62_v0 = vld [vmem:[#allocation5 + $0x18] sm:$0xff]  ;;  %v61_v1 = vld [vmem:[#allocation5 + $0x10] sm:$0xff]  ;;  %vm65_vm0 = vcmask 261120   ;;  %vm337_vm1 = vcmask 31744  }
   0xf   :  { %81 = vmatpush.msra.mxu0 %v62_v0  ;;  %v105_v2 = vld [vmem:[#allocation5 + $0x98] sm:$0xff]  ;;  %v60_v3 = vld [vmem:[#allocation5 + $0x8] sm:$0xff]  ;;  %v104_v4 = vld [vmem:[#allocation5 + $0x90] sm:$0xff]  ;;  %s499_s0 = smov 15   ;;  %s500_s2 = smov 16   ;;  %vm343_vm6 = vcmask 39968  }
  0x10   :  { %108 = vmatpush.msra.mxu1 %v105_v2  ;;  %v103_v5 = vld [vmem:[#allocation5 + $0x88] sm:$0xff]  ;;  %v59_v6 = vld [vmem:[#allocation5] sm:$0xff]  ;;  %v536_v7 = vld [vmem:[#allocation2] sm:$0xff]  ;;  %s501_s28 = smov 112   ;;  %s502_s29 = smov 111   ;;  %vm345_vm7 = vcmask 64552  }
  0x11   :  { %82 = vmatpush.msra.mxu0 %v61_v1  ;;  %v102_v8 = vld [vmem:[#allocation5 + $0x80] sm:$0xff]  ;;  %v101_v9 = vld [vmem:[#allocation5 + $0x78] sm:$0xff]  ;;  %v100_v10 = vld [vmem:[#allocation5 + $0x70] sm:$0xff]  ;;  %s503_s30 = smov 126   ;;  %s504_s4 = smov 4  }
  0x12   :  { %109 = vmatpush.msra.mxu1 %v104_v4  ;;  %v99_v11 = vld [vmem:[#allocation5 + $0x68] sm:$0xff]  ;;  %v98_v12 = vld [vmem:[#allocation5 + $0x60] sm:$0xff]  ;;  %v97_v13 = vld [vmem:[#allocation5 + $0x58] sm:$0xff]  ;;  %s505_s5 = smov [#allocation8]   ;;  %s354_s9 = sshll.u32 %s548_s3, 4  ;;  %s355_s9 = int_to_ptr.hbm [resolvable:$true] %s354_s9 }
  0x13   :  { %83 = vmatpush.msra.mxu0 %v60_v3  ;;  %v96_v14 = vld [vmem:[#allocation5 + $0x50] sm:$0xff]  ;;  %v95_v15 = vld [vmem:[#allocation5 + $0x48] sm:$0xff]  ;;  %v94_v16 = vld [vmem:[#allocation5 + $0x40] sm:$0xff]  ;;  %s352_s6 = sshll.u32 %s505_s5, 4  ;;  %s353_s6 = int_to_ptr.vmem [resolvable:$true] %s352_s6 }
  0x14   :  { %110 = vmatpush.msra.mxu1 %v103_v5  ;;  %v93_v17 = vld [vmem:[#allocation5 + $0x38] sm:$0xff]  ;;  %v92_v18 = vld [vmem:[#allocation5 + $0x30] sm:$0xff]  ;;  %v91_v19 = vld [vmem:[#allocation5 + $0x28] sm:$0xff] }
  0x15   :  { %84 = vmatpush.msra.mxu0 %v59_v6  ;;  %v90_v20 = vld [vmem:[#allocation5 + $0x20] sm:$0xff]  ;;  %v144_v21 = vld [vmem:[#allocation5 + $0x118] sm:$0xff]  ;;  %v143_v22 = vld [vmem:[#allocation5 + $0x110] sm:$0xff] }
  0x16   :  { %365 = vmatmul.msk.f32.vlgmr.msra.gmra.mxu0 %vm65_vm0, %v536_v7  ;;  %111 = vmatpush.msra.mxu1 %v102_v8  ;;  %v142_v23 = vld [vmem:[#allocation5 + $0x108] sm:$0xff]  ;;  %v141_v24 = vld [vmem:[#allocation5 + $0x100] sm:$0xff]  ;;  %v140_v25 = vld [vmem:[#allocation5 + $0xf8] sm:$0xff] }
  0x17   :  { %147 = vmatpush.msra.mxu2 %v144_v21  ;;  %v139_v26 = vld [vmem:[#allocation5 + $0xf0] sm:$0xff]  ;;  %v138_v27 = vld [vmem:[#allocation5 + $0xe8] sm:$0xff]  ;;  %v137_v28 = vld [vmem:[#allocation5 + $0xe0] sm:$0xff] }
  0x18   :  { %112 = vmatpush.msra.mxu1 %v101_v9  ;;  %v136_v29 = vld [vmem:[#allocation5 + $0xd8] sm:$0xff]  ;;  %v135_v30 = vld [vmem:[#allocation5 + $0xd0] sm:$0xff]  ;;  %v134_v31 = vld [vmem:[#allocation5 + $0xc8] sm:$0xff] }
  0x19   :  { %148 = vmatpush.msra.mxu2 %v143_v22  ;;  %v133_v32 = vld [vmem:[#allocation5 + $0xc0] sm:$0xff]  ;;  %v132_v33 = vld [vmem:[#allocation5 + $0xb8] sm:$0xff]  ;;  %v131_v38 = vld [vmem:[#allocation5 + $0xb0] sm:$0xff] }
  0x1a   :  { %113 = vmatpush.msra.mxu1 %v100_v10  ;;  %v380_v34 = vld [vmem:[#allocation7] ss:$0 sm:$0xff]  ;;  %v130_v39 = vld [vmem:[#allocation5 + $0xa8] sm:$0xff]  ;;  %v183_v41 = vld [vmem:[#allocation5 + $0x198] sm:$0xff] }
  0x1b   :  { %149 = vmatpush.msra.mxu2 %v142_v23  ;;  %v129_v40 = vld [vmem:[#allocation5 + $0xa0] sm:$0xff]  ;;  %v182_v42 = vld [vmem:[#allocation5 + $0x190] sm:$0xff]  ;;  %186 = vmatpush.msra.mxu3 %v183_v41  ;;  %v181_v43 = vld [vmem:[#allocation5 + $0x188] sm:$0xff] }
  0x1c   :  { %114 = vmatpush.msra.mxu1 %v99_v11  ;;  %v180_v44 = vld [vmem:[#allocation5 + $0x180] sm:$0xff]  ;;  %v179_v45 = vld [vmem:[#allocation5 + $0x178] sm:$0xff]  ;;  %v178_v46 = vld [vmem:[#allocation5 + $0x170] sm:$0xff] }
  0x1d   :  { %150 = vmatpush.msra.mxu2 %v141_v24  ;;  %187 = vmatpush.msra.mxu3 %v182_v42  ;;  %v177_v47 = vld [vmem:[#allocation5 + $0x168] sm:$0xff]  ;;  %v176_v48 = vld [vmem:[#allocation5 + $0x160] sm:$0xff]  ;;  %v175_v49 = vld [vmem:[#allocation5 + $0x158] sm:$0xff] }
  0x1e   :  { %115 = vmatpush.msra.mxu1 %v98_v12  ;;  %v174_v50 = vld [vmem:[#allocation5 + $0x150] sm:$0xff]  ;;  %v173_v51 = vld [vmem:[#allocation5 + $0x148] sm:$0xff]  ;;  %v172_v52 = vld [vmem:[#allocation5 + $0x140] sm:$0xff] }
  0x1f   :  { %151 = vmatpush.msra.mxu2 %v140_v25  ;;  %188 = vmatpush.msra.mxu3 %v181_v43  ;;  %v171_v53 = vld [vmem:[#allocation5 + $0x138] sm:$0xff]  ;;  %v381_v54 = vld [vmem:[#allocation7 + $0x1] ss:$0 sm:$0xff]  ;;  %v170_v58 = vld [vmem:[#allocation5 + $0x130] sm:$0xff] }
  0x20   :  { %116 = vmatpush.msra.mxu1 %v97_v13  ;;  %v169_v59 = vld [vmem:[#allocation5 + $0x128] sm:$0xff]  ;;  %v168_v60 = vld [vmem:[#allocation5 + $0x120] sm:$0xff]  ;;  %v221_v61 = vld [vmem:[#allocation5 + $0x218] sm:$0xff] }
  0x21   :  { %152 = vmatpush.msra.mxu2 %v139_v26  ;;  %189 = vmatpush.msra.mxu3 %v180_v44  ;;  %v220_v62 = vld [vmem:[#allocation5 + $0x210] sm:$0xff]  ;;  %v219_v63 = vld [vmem:[#allocation5 + $0x208] sm:$0xff]  ;;  %v218_v0 = vld [vmem:[#allocation5 + $0x200] sm:$0xff] }
  0x22   :  { %117 = vmatpush.msra.mxu1 %v96_v14  ;;  %224 = vmatpush.msrb.mxu0 %v221_v61  ;;  %v217_v1 = vld [vmem:[#allocation5 + $0x1f8] sm:$0xff]  ;;  %v216_v2 = vld [vmem:[#allocation5 + $0x1f0] sm:$0xff]  ;;  %v215_v3 = vld [vmem:[#allocation5 + $0x1e8] sm:$0xff] }
  0x23   :  { %153 = vmatpush.msra.mxu2 %v138_v27  ;;  %190 = vmatpush.msra.mxu3 %v179_v45  ;;  %v214_v4 = vld [vmem:[#allocation5 + $0x1e0] sm:$0xff]  ;;  %v213_v5 = vld [vmem:[#allocation5 + $0x1d8] sm:$0xff]  ;;  %v212_v6 = vld [vmem:[#allocation5 + $0x1d0] sm:$0xff] }
  0x24   :  { %118 = vmatpush.msra.mxu1 %v95_v15  ;;  %225 = vmatpush.msrb.mxu0 %v220_v62  ;;  %v211_v8 = vld [vmem:[#allocation5 + $0x1c8] sm:$0xff]  ;;  %v210_v9 = vld [vmem:[#allocation5 + $0x1c0] sm:$0xff]  ;;  %v209_v10 = vld [vmem:[#allocation5 + $0x1b8] sm:$0xff] }
  0x25   :  { %154 = vmatpush.msra.mxu2 %v137_v28  ;;  %191 = vmatpush.msra.mxu3 %v178_v46  ;;  %v382_v11 = vld [vmem:[#allocation7 + $0x2] ss:$0 sm:$0xff]  ;;  %v208_v12 = vld [vmem:[#allocation5 + $0x1b0] sm:$0xff]  ;;  %v256_v22 = vld [vmem:[#allocation5 + $0x278] sm:$0xff] }
  0x26   :  { %119 = vmatpush.msra.mxu1 %v94_v16  ;;  %226 = vmatpush.msrb.mxu0 %v219_v63  ;;  %v207_v16 = vld [vmem:[#allocation5 + $0x1a8] sm:$0xff]  ;;  %v257_v21 = vld [vmem:[#allocation5 + $0x280] sm:$0xff]  ;;  %v255_v23 = vld [vmem:[#allocation5 + $0x270] sm:$0xff] }
  0x27   :  { %155 = vmatpush.msra.mxu2 %v136_v29  ;;  %192 = vmatpush.msra.mxu3 %v177_v47  ;;  %v254_v24 = vld [vmem:[#allocation5 + $0x268] sm:$0xff]  ;;  %v253_v25 = vld [vmem:[#allocation5 + $0x260] sm:$0xff]  ;;  %v252_v26 = vld [vmem:[#allocation5 + $0x258] sm:$0xff]  ;;  %v366_v47 = vadd.f32 46.02, %v536_v7 }
  0x28   :  { %120 = vmatpush.msra.mxu1 %v93_v17  ;;  %227 = vmatpush.msrb.mxu0 %v218_v0  ;;  %v206_v17 = vld [vmem:[#allocation5 + $0x1a0] sm:$0xff]  ;;  %v251_v27 = vld [vmem:[#allocation5 + $0x250] sm:$0xff]  ;;  %v250_v28 = vld [vmem:[#allocation5 + $0x248] sm:$0xff] }
  0x29   :  { %156 = vmatpush.msra.mxu2 %v135_v30  ;;  %193 = vmatpush.msra.mxu3 %v176_v48  ;;  %v249_v29 = vld [vmem:[#allocation5 + $0x240] sm:$0xff]  ;;  %v248_v30 = vld [vmem:[#allocation5 + $0x238] sm:$0xff]  ;;  %vm314_vm2 = vweird.f32 %v366_v47 }
  0x2a   :  { %121 = vmatpush.msra.mxu1 %v92_v18  ;;  %228 = vmatpush.msrb.mxu0 %v217_v1  ;;  %v260_v18 = vld [vmem:[#allocation5 + $0x298] sm:$0xff]  ;;  %v385_v41 = vld [vmem:[#allocation7 + $0x5] ss:$0 sm:$0xff] }
  0x2b   :  { %157 = vmatpush.msra.mxu2 %v134_v31  ;;  %194 = vmatpush.msra.mxu3 %v175_v49  ;;  %v383_v31 = vld [vmem:[#allocation7 + $0x3] ss:$0 sm:$0xff] }
  0x2c   :  { %122 = vmatpush.msra.mxu1 %v91_v19  ;;  %229 = vmatpush.msrb.mxu0 %v216_v2  ;;  %v259_v19 = vld [vmem:[#allocation5 + $0x290] sm:$0xff] }
  0x2d   :  { %158 = vmatpush.msra.mxu2 %v133_v32  ;;  %195 = vmatpush.msra.mxu3 %v174_v50  ;;  %v320_v50 = vand.u32 2147483648, %v366_v47 }
  0x2e   :  { %123 = vmatpush.msra.mxu1 %v90_v20  ;;  %230 = vmatpush.msrb.mxu0 %v215_v3  ;;  %v258_v20 = vld [vmem:[#allocation5 + $0x288] sm:$0xff] }
  0x2f   :  { %159 = vmatpush.msra.mxu2 %v132_v33  ;;  %196 = vmatpush.msra.mxu3 %v173_v51 }
  0x30   :  { %231 = vmatpush.msrb.mxu0 %v214_v4  ;;  %263 = vmatpush.msrb.mxu1 %v260_v18 }
  0x31   :  { %160 = vmatpush.msra.mxu2 %v131_v38  ;;  %197 = vmatpush.msra.mxu3 %v172_v52  ;;  %v318_v52 = vand.u32 2147483647, %v366_v47 }
  0x32   :  { %232 = vmatpush.msrb.mxu0 %v213_v5  ;;  %264 = vmatpush.msrb.mxu1 %v259_v19 }
  0x33   :  { %161 = vmatpush.msra.mxu2 %v130_v39  ;;  %198 = vmatpush.msra.mxu3 %v171_v53  ;;  %vm319_vm5 = vcmp.eq.f32.partialorder %v318_v52, 8.507059e+37 }
  0x34   :  { %233 = vmatpush.msrb.mxu0 %v212_v6  ;;  %265 = vmatpush.msrb.mxu1 %v258_v20 }
  0x35   :  { %162 = vmatpush.msra.mxu2 %v129_v40  ;;  %199 = vmatpush.msra.mxu3 %v170_v58 }
  0x36   :  { %234 = vmatpush.msrb.mxu0 %v211_v8  ;;  %266 = vmatpush.msrb.mxu1 %v257_v21 }
  0x37   :  { %200 = vmatpush.msra.mxu3 %v169_v59 }
  0x38   :  { %235 = vmatpush.msrb.mxu0 %v210_v9  ;;  %267 = vmatpush.msrb.mxu1 %v256_v22 }
  0x39   :  { %201 = vmatpush.msra.mxu3 %v168_v60 }
  0x3a   :  { %236 = vmatpush.msrb.mxu0 %v209_v10  ;;  %268 = vmatpush.msrb.mxu1 %v255_v23 }
  0x3c   :  { %237 = vmatpush.msrb.mxu0 %v208_v12  ;;  %269 = vmatpush.msrb.mxu1 %v254_v24 }
  0x3e   :  { %238 = vmatpush.msrb.mxu0 %v207_v16  ;;  %270 = vmatpush.msrb.mxu1 %v253_v25 }
  0x40   :  { %239 = vmatpush.msrb.mxu0 %v206_v17  ;;  %271 = vmatpush.msrb.mxu1 %v252_v26 }
  0x42   :  { %272 = vmatpush.msrb.mxu1 %v251_v27 }
  0x44   :  { %273 = vmatpush.msrb.mxu1 %v250_v28 }
  0x46   :  { %274 = vmatpush.msrb.mxu1 %v249_v29 }
  0x48   :  { %275 = vmatpush.msrb.mxu1 %v248_v30 }
  0x93   :  { %v86_v35 = vpop.f32.mrf.mxu0 }
  0x94   :  { %v87_v36 = vadd.f32 %v380_v34, %v86_v35  ;;  %v247_v34 = vld [vmem:[#allocation5 + $0x230] sm:$0xff]  ;;  %v246_v35 = vld [vmem:[#allocation5 + $0x228] sm:$0xff] }
  0x95   :  { %276 = vmatpush.msrb.mxu1 %v247_v34 }
  0x96   :  { %v89_v37 = vmax.f32 %v87_v36, 0.0  ;;  %v245_v36 = vld [vmem:[#allocation5 + $0x220] sm:$0xff] }
  0x97   :  { %277 = vmatpush.msrb.mxu1 %v246_v35 }
  0x98   :  { %124 = vmatmul.f32.vlgmr.msra.gmra.mxu1 %v89_v37  ;;  %v384_v37 = vld [vmem:[#allocation7 + $0x4] ss:$0 sm:$0xff] }
  0x99   :  { %278 = vmatpush.msrb.mxu1 %v245_v36 }
 0x115   :  { %v125_v55 = vpop.f32.mrf.mxu1 }
 0x116   :  { %v126_v56 = vadd.f32 %v381_v54, %v125_v55  ;;  %v321_v54 = vor.u32 1.1754944e-38, %v320_v50 }
 0x118   :  { %v128_v57 = vmax.f32 %v126_v56, 0.0 }
 0x11a   :  { %163 = vmatmul.f32.vlgmr.msra.gmra.mxu2 %v128_v57 }
 0x19d   :  { %v164_v13 = vpop.f32.mrf.mxu2 }
 0x19e   :  { %v165_v14 = vadd.f32 %v382_v11, %v164_v13  ;;  %v506_v13 = vmov 0.0  }
 0x1a0   :  { %v167_v15 = vmax.f32 %v165_v14, 0.0 }
 0x1a2   :  { %202 = vmatmul.f32.vlgmr.msra.gmra.mxu3 %v167_v15 }
 0x225   :  { %v203_v32 = vpop.f32.mrf.mxu3 }
 0x226   :  { %v204_v33 = vadd.f32 %v383_v31, %v203_v32 }
 0x228   :  { %240 = vmatmul.f32.vlgmr.msrb.gmra.mxu0 %v204_v33 }
 0x2a5   :  { %v241_v38 = vpop.f32.mrf.mxu0 }
 0x2a6   :  { %v242_v39 = vadd.f32 %v384_v37, %v241_v38 }
 0x2a8   :  { %v244_v40 = vmax.f32 %v242_v39, 0.0 }
 0x2aa   :  { %279 = vmatmul.f32.vlgmr.msrb.gmra.mxu1 %v244_v40 }
 0x327   :  { %v280_v42 = vpop.f32.mrf.mxu1 }
 0x328   :  { %v281_v43 = vadd.f32 %v385_v41, %v280_v42 }
 0x32a   :  { %v283_v44 = vmul.f32 0.5, %v281_v43  ;;  %338 = vst.msk [vmem:[#allocation8] sm:$0xff] %vm337_vm1, %v281_v43 }
 0x32c   :  { %v284_v45 = vmul.f32 1.442695, %v283_v44 }
 0x32e   :  { %386 = vpow2.f32 %v284_v45 }
 0x32f   :  { %388 = vrcp.f32 %v366_v47 }
 0x334   :  { %v387_v46 = vpop.eup %386 }
 0x335   :  { %298 = vrot.lane.b32.xlu0 %v387_v46, %s499_s0  ;;  %v389_v48 = vpop.eup %388 }
 0x336   :  { %v310_v49 = vmul.f32 %v389_v48, %v366_v47  ;;  %vm315_vm3 = vweird.f32 %v389_v48 }
 0x337   :  { %vm316_vm4 = vmor %vm314_vm2, %vm315_vm3 }
 0x338   :  { %v311_v51 = vsub.f32 1.0, %v310_v49 }
 0x33a   :  { %v312_v53 = vmul.f32 %v389_v48, %v311_v51 }
 0x33c   :  { %v313_v55 = vadd.f32 %v389_v48, %v312_v53 }
 0x33d   :  { %287 = vrot.lane.b32.xlu0 %v387_v46, %s500_s2 }
 0x33e   :  { %v317_v56 = vsel %vm316_vm4, %v389_v48, %v313_v55 }
 0x33f   :  { %v322_v57 = vsel %vm319_vm5, %v321_v54, %v317_v56 }
 0x340   :  { %v324_v58 = vsub.f32 0.01638807, %v322_v57 }
 0x342   :  { %326 = vrot.lane.b32.xlu2 %v324_v58, %s501_s28 }
 0x39c   :  { %v327_v6 = vpop.permute.xlu2 %326 }
 0x3a7   :  { %v299_v59 = vpop.permute.xlu0 %298 }
 0x3a8   :  { %v301_v60 = vmul.f32 %v299_v59, %v536_v7 }
 0x3aa   :  { %303 = vrot.lane.b32.xlu1 %v301_v60, %s501_s28 }
 0x3af   :  { %v288_v61 = vpop.permute.xlu0 %287 }
 0x3b0   :  { %v290_v62 = vmul.f32 %v288_v61, %v536_v7 }
 0x3b2   :  { %292 = vrot.lane.b32.xlu1 %v290_v62, %s502_s29 }
 0x41c   :  { %v304_v63 = vpop.permute.xlu1 %303 }
 0x41d   :  { %v306_v0 = vadd.f32 %v304_v63, %v281_v43 }
 0x41f   :  { %v307_v1 = vand.u32 2147483647, %v306_v0 }
 0x421   :  { %333 = vrot.lane.b32.xlu2 %v307_v1, %s503_s30 }
 0x424   :  { %v293_v2 = vpop.permute.xlu1 %292 }
 0x425   :  { %v295_v3 = vadd.f32 %v293_v2, %v281_v43 }
 0x427   :  { %v296_v4 = vmax.f32 %v295_v3, 50.0 }
 0x429   :  { %v297_v5 = vmin.f32 %v296_v4, 500.0 }
 0x42b   :  { %v329_v8 = vmul.f32 %v327_v6, %v297_v5 }
 0x42d   :  { %v330_v9 = vmul.f32 1.442695, %v329_v8 }
 0x42f   :  { %390 = vpow2.f32 %v330_v9 }
 0x435   :  { %v391_v10 = vpop.eup %390 }
 0x47b   :  { %v334_v11 = vpop.permute.xlu2 %333 }
 0x47c   :  { %v336_v12 = vmul.f32 %v391_v10, %v334_v11 }
 0x47e   :  { %340 = vrot.lane.b32.xlu0 %v336_v12, %s504_s4 }
 0x4f0   :  { %v341_v7 = vpop.permute.xlu0 %340 }
 0x4f1   :  { %344 = vst.msk [vmem:[#allocation8] sm:$0xff] %vm343_vm6, %v341_v7 }
 0x4f2   :  { %346 = vst.msk [vmem:[#allocation8] sm:$0xff] %vm345_vm7, %v506_v13 }
 0x4f3   :  { %357 = dma.vmem_to_hbm [thread:$0]  %s353_s6, 128, %s355_s9, [#allocation4]  }
 0x4f4   :  { %492 = dma.done.wait [#allocation4], 128  }
 0x4f5   :  { %493 = vsyncadd [#allocation4], 4294967168 }
 0x4f6   :  { %362 = vsyncpa [#allocation3], 1 }
 0x4f7   :  { %363 = vsyncpa [#allocation6], 1 }
 0x4f8   :  { %364 = vsyncpa [#allocation4], 1 }

</bundles_post_ra>
